<compile_context>
chip_gen: v7x
topology: tpu7x:2x2x1
jax: 0.10.0
libtpu: 0.0.40
codegen_flags: <defaults>
</compile_context>

<pallas_src>
import functools

import jax
import jax.numpy as jnp
from jax import lax
from jax.experimental import pallas as pl
from jax.experimental.pallas import tpu as pltpu


# ----------------------------- Pallas kernel -------------------------------

def actor_mlp_kernel(x_ref, w1_ref, b1_ref, w2_ref, b2_ref, w3_ref, b3_ref,
                     out_ref):
    """3-layer MLP + softmax on one batch tile; batch lives on the lane axis.

    x_ref  : (TB, Din)  batch tile in the natural HBM layout (rows = batch)
    w*_ref : PyTorch (out, in) layout weights, VMEM-resident
    b*_ref : (out, 1) column biases (broadcast over the lane/batch axis)
    out_ref: (A, TB)    probabilities, batch on lanes (transposed in wrapper)
    """
    x = x_ref[...]                                           # (TB, Din) f32

    # fc1 + tanh: contract Din of both operands (trans-B matmul) -> (H, TB).
    h1 = lax.dot_general(w1_ref[...], x, (((1,), (1,)), ((), ())),
                         preferred_element_type=jnp.float32)
    h1 = jnp.tanh(h1 + b1_ref[...])                          # (H, TB)

    # fc2 + tanh: (H, H) @ (H, TB) -> (H, TB).
    h2 = jnp.dot(w2_ref[...], h1, preferred_element_type=jnp.float32)
    h2 = jnp.tanh(h2 + b2_ref[...])

    # fc3 + softmax over the action axis (axis 0 here; batch is on lanes).
    logits = jnp.dot(w3_ref[...], h2, preferred_element_type=jnp.float32)
    logits = logits + b3_ref[...]                            # (A, TB)
    m = jnp.max(logits, axis=0, keepdims=True)               # (1, TB)
    e = jnp.exp(logits - m)                                  # (A, TB)
    denom = jnp.sum(e, axis=0, keepdims=True)                # (1, TB) lane-dense
    # EUP approx reciprocal + one Newton-Raphson refinement: avoids the VPU
    # divide while keeping full f32 accuracy (error squared by the refinement).
    inv = pl.reciprocal(denom, approx=True)
    inv = inv * (2.0 - denom * inv)
    out_ref[...] = (e * inv).astype(out_ref.dtype)


# ------------------------------- helpers ------------------------------------

def _round_up(n, m):
    return ((n + m - 1) // m) * m


@functools.lru_cache(maxsize=None)
def _num_tensorcores():
    """Best-effort TensorCore count of the local device (v7x -> 2); safe fallback 1."""
    try:
        dev = jax.devices()[0]
    except Exception:
        return 1
    for attr in ("num_cores", "core_count", "num_tensorcores"):
        v = getattr(dev, attr, None)
        try:
            v = int(v)
        except (TypeError, ValueError):
            continue
        if v > 0:
            return v
    return 1


def _select_batch_tiling(B, block_batch, min_steps):
    """Pick (TB, num_steps) for the batch grid.

    Single-step grids use TB == B (full-extent blocks are always legal, no
    padding at all).  Multi-step grids use lane-aligned tiles (TB % 128 == 0)
    with a ragged last tile handled by Pallas edge masking.
    """
    block_batch = max(128, _round_up(block_batch, 128))
    want_multi = (min_steps > 1) and (B >= 256)      # don't split tiny batches
    if B <= block_batch and not want_multi:
        return B, 1
    steps = max(min_steps if want_multi else 1, pl.cdiv(B, block_batch))
    tb = _round_up(pl.cdiv(B, steps), 128)
    nb = pl.cdiv(B, tb)
    return tb, nb


def prepare_actor_mlp_params(w1, b1, w2, b2, w3, b3):
    """One-time parameter prep (do at init, NOT per forward call).

    Weights keep the PyTorch (out_features, in_features) layout; biases become
    (out, 1) columns so they broadcast over the lane (batch) axis in-kernel."""
    f32 = lambda a: jnp.asarray(a, jnp.float32)
    return (f32(w1), f32(b1)[:, None],
            f32(w2), f32(b2)[:, None],
            f32(w3), f32(b3)[:, None])


# ------------------------------- wrapper ------------------------------------

@functools.partial(jax.jit, static_argnames=("block_batch", "min_grid_steps"))
def actor_mlp_forward(x, params, *, block_batch=4096, min_grid_steps=None):
    """x: (B, actor_input_dim) f32; params: output of prepare_actor_mlp_params.

    Returns prob of shape (B, action_dim)."""
    w1, b1c, w2, b2c, w3, b3c = params
    B, Din = x.shape
    H = w1.shape[0]
    A = w3.shape[0]

    if min_grid_steps is None:
        min_grid_steps = _num_tensorcores()
    TB, nb = _select_batch_tiling(B, block_batch, min_grid_steps)

    const = lambda i: (0, 0)                         # weights/biases VMEM-resident
    grid_spec = pltpu.PrefetchScalarGridSpec(
        num_scalar_prefetch=0,
        grid=(nb,),
        in_specs=[
            pl.BlockSpec((TB, Din), lambda i: (i, 0)),   # batch tile (natural layout)
            pl.BlockSpec((H, Din), const),
            pl.BlockSpec((H, 1), const),
            pl.BlockSpec((H, H), const),
            pl.BlockSpec((H, 1), const),
            pl.BlockSpec((A, H), const),
            pl.BlockSpec((A, 1), const),
        ],
        out_specs=pl.BlockSpec((A, TB), lambda i: (0, i)),   # batch on lanes
    )

    out_t = pl.pallas_call(
        actor_mlp_kernel,
        out_shape=jax.ShapeDtypeStruct((A, B), jnp.float32),
        grid_spec=grid_spec,
        compiler_params=pltpu.CompilerParams(
            dimension_semantics=("parallel",)),      # megacore sharding on v7x
    )(x, w1, b1c, w2, b2c, w3, b3c)

    return out_t.T                                   # (B, A) for the caller


# ------------------------- deterministic parameter init --------------------

def orthogonal(key, shape, gain=1.0, dtype=jnp.float32):
    """Mimics torch.nn.init.orthogonal_ for a 2D weight of shape (out, in)."""
    rows, cols = shape
    flat = jax.random.normal(key, (rows, cols), dtype=jnp.float32)
    if rows < cols:
        flat = flat.T
    q, r = jnp.linalg.qr(flat)
    d = jnp.sign(jnp.diag(r))
    q = q * d[None, :]
    if rows < cols:
        q = q.T
    return (gain * q).astype(dtype)


def init_actor_mlp_params(key, actor_input_dim, hidden_dim, action_dim):
    k1, k2, k3 = jax.random.split(key, 3)
    # PyTorch Linear weight shape: (out_features, in_features); bias zeros.
    w1 = orthogonal(k1, (hidden_dim, actor_input_dim), gain=1.0)
    w2 = orthogonal(k2, (hidden_dim, hidden_dim), gain=1.0)
    w3 = orthogonal(k3, (action_dim, hidden_dim), gain=0.01)
    b1 = jnp.zeros((hidden_dim,), jnp.float32)
    b2 = jnp.zeros((hidden_dim,), jnp.float32)
    b3 = jnp.zeros((action_dim,), jnp.float32)
    return w1, b1, w2, b2, w3, b3


# --------------------------------- main -------------------------------------

if __name__ == "__main__":
    # Small shapes consistent with the module's forward.
    BATCH = 8
    ACTOR_INPUT_DIM = 16
    MLP_HIDDEN_DIM = 32
    ACTION_DIM = 8

    key = jax.random.PRNGKey(0)
    kx, kp = jax.random.split(key)

    x = jax.random.normal(kx, (BATCH, ACTOR_INPUT_DIM), jnp.float32)
    w1, b1, w2, b2, w3, b3 = init_actor_mlp_params(
        kp, ACTOR_INPUT_DIM, MLP_HIDDEN_DIM, ACTION_DIM)

    # One-time parameter prep (hot path has no per-call transposes/reshapes).
    params = prepare_actor_mlp_params(w1, b1, w2, b2, w3, b3)

    prob = actor_mlp_forward(x, params)
    prob = jax.block_until_ready(prob)

    # Pure-JAX reference check (tanh activation, softmax over last dim).
    h1 = jnp.tanh(x @ w1.T + b1)
    h2 = jnp.tanh(h1 @ w2.T + b2)
    ref = jax.nn.softmax(h2 @ w3.T + b3, axis=-1)

    assert prob.shape == (BATCH, ACTION_DIM)
    assert jnp.allclose(jnp.sum(prob, axis=-1), 1.0, atol=1e-5)
    assert jnp.allclose(prob, ref, atol=1e-5, rtol=1e-5)

    print("KERNEL_OK")
</pallas_src>

<mosaic_0001>
module attributes {stable_mosaic.version = 11 : i64} {
  func.func @actor_mlp_kernel(%arg0: i32, %arg1: memref<8x16xf32, #tpu.memory_space<vmem>>, %arg2: memref<32x16xf32, #tpu.memory_space<vmem>>, %arg3: memref<32x1xf32, #tpu.memory_space<vmem>>, %arg4: memref<32x32xf32, #tpu.memory_space<vmem>>, %arg5: memref<32x1xf32, #tpu.memory_space<vmem>>, %arg6: memref<8x32xf32, #tpu.memory_space<vmem>>, %arg7: memref<8x1xf32, #tpu.memory_space<vmem>>, %arg8: memref<8x8xf32, #tpu.memory_space<vmem>>) attributes {dimension_semantics = [#tpu.dimension_semantics<parallel>], iteration_bounds = array<i64: 1>, scalar_prefetch = 0 : i64, scratch_operands = 0 : i64, tpu.core_type = #tpu.core_type<tc>, window_params = [{transform_indices = @transform_0, window_bounds = array<i64: 8, 16>}, {pipeline_mode = #tpu.pipeline_mode<synchronous>, transform_indices = @transform_1, window_bounds = array<i64: 32, 16>}, {pipeline_mode = #tpu.pipeline_mode<synchronous>, transform_indices = @transform_2, window_bounds = array<i64: 32, 1>}, {pipeline_mode = #tpu.pipeline_mode<synchronous>, transform_indices = @transform_3, window_bounds = array<i64: 32, 32>}, {pipeline_mode = #tpu.pipeline_mode<synchronous>, transform_indices = @transform_4, window_bounds = array<i64: 32, 1>}, {pipeline_mode = #tpu.pipeline_mode<synchronous>, transform_indices = @transform_5, window_bounds = array<i64: 8, 32>}, {pipeline_mode = #tpu.pipeline_mode<synchronous>, transform_indices = @transform_6, window_bounds = array<i64: 8, 1>}, {transform_indices = @transform_7, window_bounds = array<i64: 8, 8>}]} {
    %c0 = arith.constant 0 : index
    %c0_0 = arith.constant 0 : index
    %0 = vector.load %arg1[%c0, %c0_0] : memref<8x16xf32, #tpu.memory_space<vmem>>, vector<8x16xf32>
    %c0_1 = arith.constant 0 : index
    %c0_2 = arith.constant 0 : index
    %1 = vector.load %arg2[%c0_1, %c0_2] : memref<32x16xf32, #tpu.memory_space<vmem>>, vector<32x16xf32>
    %cst = arith.constant dense<0.000000e+00> : vector<32x8xf32>
    %2 = tpu.matmul %1, %0, %cst {dimension_numbers = #tpu.dot_dimension_numbers<[1], [1], [0], [0], [0, 0, 1, 0], [], []>} : vector<32x16xf32>, vector<8x16xf32>, vector<32x8xf32> -> vector<32x8xf32>
    %c0_3 = arith.constant 0 : index
    %c0_4 = arith.constant 0 : index
    %3 = vector.load %arg3[%c0_3, %c0_4] : memref<32x1xf32, #tpu.memory_space<vmem>>, vector<32x1xf32>
    %4 = vector.broadcast %3 : vector<32x1xf32> to vector<32x8xf32>
    %5 = arith.addf %2, %4 : vector<32x8xf32>
    %6 = math.tanh %5 : vector<32x8xf32>
    %c0_5 = arith.constant 0 : index
    %c0_6 = arith.constant 0 : index
    %7 = vector.load %arg4[%c0_5, %c0_6] : memref<32x32xf32, #tpu.memory_space<vmem>>, vector<32x32xf32>
    %cst_7 = arith.constant dense<0.000000e+00> : vector<32x8xf32>
    %8 = tpu.matmul %7, %6, %cst_7 {dimension_numbers = #tpu.dot_dimension_numbers<[1], [0], [0], [1], [0, 0, 1, 1], [], []>} : vector<32x32xf32>, vector<32x8xf32>, vector<32x8xf32> -> vector<32x8xf32>
    %c0_8 = arith.constant 0 : index
    %c0_9 = arith.constant 0 : index
    %9 = vector.load %arg5[%c0_8, %c0_9] : memref<32x1xf32, #tpu.memory_space<vmem>>, vector<32x1xf32>
    %10 = vector.broadcast %9 : vector<32x1xf32> to vector<32x8xf32>
    %11 = arith.addf %8, %10 : vector<32x8xf32>
    %12 = math.tanh %11 : vector<32x8xf32>
    %c0_10 = arith.constant 0 : index
    %c0_11 = arith.constant 0 : index
    %13 = vector.load %arg6[%c0_10, %c0_11] : memref<8x32xf32, #tpu.memory_space<vmem>>, vector<8x32xf32>
    %cst_12 = arith.constant dense<0.000000e+00> : vector<8x8xf32>
    %14 = tpu.matmul %13, %12, %cst_12 {dimension_numbers = #tpu.dot_dimension_numbers<[1], [0], [0], [1], [0, 0, 1, 1], [], []>} : vector<8x32xf32>, vector<32x8xf32>, vector<8x8xf32> -> vector<8x8xf32>
    %c0_13 = arith.constant 0 : index
    %c0_14 = arith.constant 0 : index
    %15 = vector.load %arg7[%c0_13, %c0_14] : memref<8x1xf32, #tpu.memory_space<vmem>>, vector<8x1xf32>
    %16 = vector.broadcast %15 : vector<8x1xf32> to vector<8x8xf32>
    %17 = arith.addf %14, %16 : vector<8x8xf32>
    %cst_15 = arith.constant dense<0xFF800000> : vector<8xf32>
    %18 = vector.multi_reduction <maximumf>, %17, %cst_15 [0] : vector<8x8xf32> to vector<8xf32>
    %19 = vector.shape_cast %18 : vector<8xf32> to vector<1x8xf32>
    %20 = vector.broadcast %19 : vector<1x8xf32> to vector<8x8xf32>
    %21 = arith.subf %17, %20 : vector<8x8xf32>
    %22 = math.exp %21 : vector<8x8xf32>
    %cst_16 = arith.constant dense<0.000000e+00> : vector<8xf32>
    %23 = vector.multi_reduction <add>, %22, %cst_16 [0] : vector<8x8xf32> to vector<8xf32>
    %24 = vector.shape_cast %23 : vector<8xf32> to vector<1x8xf32>
    %25 = tpu.reciprocal %24 {approx = true} : vector<1x8xf32> -> vector<1x8xf32>
    %26 = arith.mulf %24, %25 : vector<1x8xf32>
    %cst_17 = arith.constant 2.000000e+00 : f32
    %27 = vector.broadcast %cst_17 : f32 to vector<1x8xf32>
    %28 = arith.subf %27, %26 : vector<1x8xf32>
    %29 = arith.mulf %25, %28 : vector<1x8xf32>
    %30 = vector.broadcast %29 : vector<1x8xf32> to vector<8x8xf32>
    %31 = arith.mulf %22, %30 : vector<8x8xf32>
    %c0_18 = arith.constant 0 : index
    %c0_19 = arith.constant 0 : index
    %32 = vector.load %arg8[%c0_18, %c0_19] : memref<8x8xf32, #tpu.memory_space<vmem>>, vector<8x8xf32>
    tpu.vector_store %arg8[%c0_18, %c0_19], %31 {strides = array<i32>} : memref<8x8xf32, #tpu.memory_space<vmem>>, vector<8x8xf32>,
    return
  }
  func.func @transform_0(%arg0: i32) -> (i32, i32) {
    %c0_i32 = arith.constant 0 : i32
    %c0_i32_0 = arith.constant 0 : i32
    return %arg0, %c0_i32 : i32, i32
  }
  func.func @transform_1(%arg0: i32) -> (i32, i32) {
    %c0_i32 = arith.constant 0 : i32
    %c0_i32_0 = arith.constant 0 : i32
    %c0_i32_1 = arith.constant 0 : i32
    return %c0_i32, %c0_i32_0 : i32, i32
  }
  func.func @transform_2(%arg0: i32) -> (i32, i32) {
    %c0_i32 = arith.constant 0 : i32
    %c0_i32_0 = arith.constant 0 : i32
    %c0_i32_1 = arith.constant 0 : i32
    return %c0_i32, %c0_i32_0 : i32, i32
  }
  func.func @transform_3(%arg0: i32) -> (i32, i32) {
    %c0_i32 = arith.constant 0 : i32
    %c0_i32_0 = arith.constant 0 : i32
    %c0_i32_1 = arith.constant 0 : i32
    return %c0_i32, %c0_i32_0 : i32, i32
  }
  func.func @transform_4(%arg0: i32) -> (i32, i32) {
    %c0_i32 = arith.constant 0 : i32
    %c0_i32_0 = arith.constant 0 : i32
    %c0_i32_1 = arith.constant 0 : i32
    return %c0_i32, %c0_i32_0 : i32, i32
  }
  func.func @transform_5(%arg0: i32) -> (i32, i32) {
    %c0_i32 = arith.constant 0 : i32
    %c0_i32_0 = arith.constant 0 : i32
    %c0_i32_1 = arith.constant 0 : i32
    return %c0_i32, %c0_i32_0 : i32, i32
  }
  func.func @transform_6(%arg0: i32) -> (i32, i32) {
    %c0_i32 = arith.constant 0 : i32
    %c0_i32_0 = arith.constant 0 : i32
    %c0_i32_1 = arith.constant 0 : i32
    return %c0_i32, %c0_i32_0 : i32, i32
  }
  func.func @transform_7(%arg0: i32) -> (i32, i32) {
    %c0_i32 = arith.constant 0 : i32
    %c0_i32_0 = arith.constant 0 : i32
    return %c0_i32, %arg0 : i32, i32
  }
}

</mosaic_0001>

<bundles_post_ra>
// kernel: actor_mlp_forward.1
= control target key start
LH: loop header
LB: loop body
LE: loop exit
PB: predicated region body
PF: predicated region fallthrough
CT: control target
= control target key end

     0   :  { %vm55_vm0 = vcmask 130048   ;;  %v499_v2 = vmov 0   ;;  %vm188_vm1 = vcmask 261120   ;;  %v500_v37 = vmov 0.0|0.0   ;;  %s617_s0 = inlined_call_operand.vmem [shape: f32[8,16], index: 0, kind: input, shape index: {}]   ;;  %s618_s1 = inlined_call_operand.vmem [shape: f32[32,16], index: 1, kind: input, shape index: {}]   ;;  %s619_s2 = inlined_call_operand.vmem [shape: f32[32,1], index: 2, kind: input, shape index: {}]   ;;  %s620_s4 = inlined_call_operand.vmem [shape: f32[32,1], index: 4, kind: input, shape index: {}]   ;;  %s621_s6 = inlined_call_operand.vmem [shape: f32[8,1], index: 6, kind: input, shape index: {}]   ;;  %s622_s3 = inlined_call_operand.vmem [shape: f32[32,32], index: 3, kind: input, shape index: {}]   ;;  %s623_s5 = inlined_call_operand.vmem [shape: f32[8,32], index: 5, kind: input, shape index: {}]   ;;  %s624_s7 = inlined_call_operand.vmem [shape: f32[8,8], index: 7, kind: output, shape index: {}]  }
   0x1   :  { %v26_v0 = vld [vmem:[%s617_s0] sm:$0xff]  ;;  %477 = vset.pattern.permute.xlu0 %v499_v2  ;;  %478 = vset.pattern.permute.xlu1 %v499_v2  ;;  %v28_v4 = vld [vmem:[%s618_s1 + $0x8] sm:$0xff]  ;;  %v33_v5 = vld [vmem:[%s619_s2 + $0x10] sm:$0xff]  ;;  %vm501_vm2 = vmmov 0   ;;  %v502_v38 = vmov 0.0   ;;  %vm370_vm3 = vcmask 64512  }
   0x2   :  { %v27_v1 = vld [vmem:[%s618_s1] sm:$0xff]  ;;  %426 = vmatprep.subr.msk.mxu0 %vm55_vm0, %v26_v0  ;;  %v29_v6 = vld [vmem:[%s618_s1 + $0x10] sm:$0xff]  ;;  %v32_v7 = vld [vmem:[%s619_s2 + $0x8] sm:$0xff]  ;;  %47 = vperm.xlu1 %478, %v33_v5  }
   0x3   :  { %428 = vmatprep.mubr.msk.f32.mxu0 %vm55_vm0, %v27_v1  ;;  %v31_v3 = vld [vmem:[%s619_s2] sm:$0xff]  ;;  %427 = vmatpush3.xpose.msk.msra.mxu0 %vm55_vm0, %v26_v0  ;;  %v34_v8 = vld [vmem:[%s619_s2 + $0x18] sm:$0xff]  ;;  %v165_v11 = vld [vmem:[%s620_s4 + $0x8] sm:$0xff] }
   0x4   :  { %37 = vperm.xlu0 %477, %v31_v3   ;;  %v30_v9 = vld [vmem:[%s618_s1 + $0x18] sm:$0xff]  ;;  %v164_v10 = vld [vmem:[%s620_s4] sm:$0xff]  ;;  %v166_v12 = vld [vmem:[%s620_s4 + $0x10] sm:$0xff]  ;;  %467 = vmatprep.subr.bf16.mxu0 %v500_v37 }
   0x5   :  { %v167_v13 = vld [vmem:[%s620_s4 + $0x18] sm:$0xff]  ;;  %v291_v14 = vld [vmem:[%s621_s6] sm:$0xff]  ;;  %v161_v34 = vld [vmem:[%s622_s3 + $0x8] sm:$0xff] }
   0x6   :  { %429 = vmatmul.mubr.msk.f32.vlgmr.msra.gmra.mrb[0].mxu0 %vm55_vm0, %v28_v4  ;;  %52 = vperm.xlu1 %478, %v34_v8   ;;  %v160_v15 = vld [vmem:[%s622_s3] sm:$0xff]  ;;  %v162_v35 = vld [vmem:[%s622_s3 + $0x10] sm:$0xff]  ;;  %v163_v36 = vld [vmem:[%s622_s3 + $0x18] sm:$0xff] }
   0x7   :  { %431 = vmatprep.mubr.msk.f32.mxu0 %vm55_vm0, %v29_v6  ;;  %442 = vmatprep.mubr.msk.f32.mxu1 %vm188_vm1, %v160_v15  ;;  %v290_v57 = vld [vmem:[%s623_s5] sm:$0xff] }
   0x8   :  { %42 = vperm.xlu0 %477, %v32_v7  }
   0xa   :  { %432 = vmatmul.mubr.msk.f32.gmra.mrb[2].mxu0 %vm55_vm0, %v30_v9  ;;  %175 = vperm.xlu1 %478, %v165_v11  }
   0xb   :  { %456 = vmatprep.mubr.msk.f32.mxu0 %vm501_vm2, %v502_v38 }
   0xc   :  { %170 = vperm.xlu0 %477, %v164_v10  }
   0xe   :  { %185 = vperm.xlu1 %478, %v167_v13  }
  0x10   :  { %180 = vperm.xlu0 %477, %v166_v12  }
  0x14   :  { %294 = vperm.xlu0 %477, %v291_v14  }
  0x81   :  { %v48_v17 = vpop.permute.xlu1 %47 }
  0x83   :  { %v38_v16 = vpop.permute.xlu0 %37 }
  0x85   :  { %v53_v23 = vpop.permute.xlu1 %52 }
  0x87   :  { %v43_v18 = vpop.permute.xlu0 %42 }
  0x89   :  { %v176_v39 = vpop.permute.xlu1 %175 }
  0x8b   :  { %v171_v40 = vpop.permute.xlu0 %170 }
  0x8d   :  { %v186_v45 = vpop.permute.xlu1 %185 }
  0x8f   :  { %v181_v47 = vpop.permute.xlu0 %180 }
  0x93   :  { %v295_v58 = vpop.permute.xlu0 %294 }
  0xd9   :  { %v430_v19 = vpop.f32.mrb[0].mxu0 }
  0xda   :  { %v143_v20 = vadd.f32 %v430_v19, %v43_v18  ;;  %v137_v21 = vpop.f32.mrb[1].mxu0 }
  0xdb   :  { %v138_v22 = vadd.f32 %v137_v21, %v38_v16 }
  0xdc   :  { %479 = vtanh.f32 %v143_v20 }
  0xdd   :  { %481 = vtanh.f32 %v138_v22  ;;  %v433_v24 = vpop.f32.mrb[2].mxu0 }
  0xde   :  { %v153_v25 = vadd.f32 %v433_v24, %v53_v23  ;;  %v147_v26 = vpop.f32.mrb[3].mxu0 }
  0xdf   :  { %v148_v27 = vadd.f32 %v147_v26, %v48_v17 }
  0xe0   :  { %483 = vtanh.f32 %v153_v25 }
  0xe1   :  { %485 = vtanh.f32 %v148_v27 }
  0xe6   :  { %v480_v28 = vpop.eup %479 }
  0xe7   :  { %v482_v29 = vpop.eup %481 }
  0xe8   :  { %v459_v30 = vpack.c.bf16 %v480_v28, %v482_v29 }
  0xea   :  { %v484_v31 = vpop.eup %483  ;;  %460 = vmatprep.subr.bf16.mxu1 %v459_v30 }
  0xeb   :  { %v486_v32 = vpop.eup %485  ;;  %462 = vmatpush3.bf16.msra.mxu1 %v459_v30 }
  0xec   :  { %v463_v33 = vpack.c.bf16 %v484_v31, %v486_v32 }
  0xee   :  { %464 = vmatprep.subr.bf16.mxu1 %v463_v33 }
  0xef   :  { %466 = vmatpush3.bf16.msra.mxu1 %v463_v33 }
  0xf2   :  { %443 = vmatmul.mubr.msk.f32.vlgmr.msra.gmra.mrb[0].mxu1 %vm188_vm1, %v161_v34 }
  0xf3   :  { %445 = vmatprep.mubr.msk.f32.mxu1 %vm188_vm1, %v162_v35 }
  0xf6   :  { %446 = vmatmul.mubr.msk.f32.gmra.mrb[2].mxu1 %vm188_vm1, %v163_v36 }
 0x1c5   :  { %v444_v41 = vpop.f32.mrb[0].mxu1 }
 0x1c6   :  { %v273_v42 = vadd.f32 %v444_v41, %v176_v39  ;;  %v267_v43 = vpop.f32.mrb[1].mxu1 }
 0x1c7   :  { %v268_v44 = vadd.f32 %v267_v43, %v171_v40 }
 0x1c8   :  { %487 = vtanh.f32 %v273_v42 }
 0x1c9   :  { %489 = vtanh.f32 %v268_v44  ;;  %v447_v46 = vpop.f32.mrb[2].mxu1 }
 0x1ca   :  { %v283_v48 = vadd.f32 %v447_v46, %v186_v45  ;;  %v277_v49 = vpop.f32.mrb[3].mxu1 }
 0x1cb   :  { %v278_v50 = vadd.f32 %v277_v49, %v181_v47 }
 0x1cc   :  { %491 = vtanh.f32 %v283_v48 }
 0x1cd   :  { %493 = vtanh.f32 %v278_v50 }
 0x1d2   :  { %v488_v51 = vpop.eup %487 }
 0x1d3   :  { %v490_v52 = vpop.eup %489 }
 0x1d4   :  { %v468_v53 = vpack.c.bf16 %v488_v51, %v490_v52 }
 0x1d6   :  { %v492_v54 = vpop.eup %491  ;;  %469 = vmatpush3.bf16.msra.mxu0 %v468_v53 }
 0x1d7   :  { %v494_v55 = vpop.eup %493  ;;  %470 = vmatprep.subr.bf16.mxu0 %v500_v37 }
 0x1d8   :  { %v471_v56 = vpack.c.bf16 %v492_v54, %v494_v55 }
 0x1da   :  { %472 = vmatpush3.bf16.msra.mxu0 %v471_v56 }
 0x1dd   :  { %457 = vmatmul.mubr.msk.f32.vlgmr.msra.gmra.mrb[4].mxu0 %vm188_vm1, %v290_v57 }
 0x2b0   :  { %v366_v59 = vpop.f32.mrb[4].mxu0 }
 0x2b1   :  { %v367_v60 = vadd.f32 %v366_v59, %v295_v58  ;;  %v458_v61 = vpop.f32.mrb[5].mxu0 }
 0x2b3   :  { %v371_v62 = vsel %vm370_vm3, %v367_v60, -inf }
 0x2b4   :  { %v372_v63 = vrot.slane %v371_v62, 4 }
 0x2b6   :  { %v373_v0 = vmax.f32 %v371_v62, %v372_v63 }
 0x2b8   :  { %v374_v1 = vrot.slane %v373_v0, 2 }
 0x2ba   :  { %v375_v2 = vmax.f32 %v373_v0, %v374_v1 }
 0x2bc   :  { %v376_v3 = vrot.slane %v375_v2, 1 }
 0x2be   :  { %v377_v4 = vmax.f32 %v375_v2, %v376_v3 }
 0x2c0   :  { %v378_v5 = vsub.f32 %v367_v60, %v377_v4 }
 0x2c2   :  { %v379_v6 = vmul.f32 1.442695, %v378_v5 }
 0x2c4   :  { %495 = vpow2.f32 %v379_v6 }
 0x2ce   :  { %v496_v7 = vpop.eup %495 }
 0x2cf   :  { %v381_v8 = vsel %vm370_vm3, %v496_v7, 0.0 }
 0x2d0   :  { %v382_v9 = vrot.slane %v381_v8, 4 }
 0x2d2   :  { %v383_v10 = vadd.f32 %v382_v9, %v381_v8 }
 0x2d4   :  { %v384_v11 = vrot.slane %v383_v10, 2 }
 0x2d6   :  { %v385_v12 = vadd.f32 %v384_v11, %v383_v10 }
 0x2d8   :  { %v386_v13 = vrot.slane %v385_v12, 1 }
 0x2da   :  { %v387_v14 = vadd.f32 %v386_v13, %v385_v12 }
 0x2dc   :  { %497 = vrcp.f32 %v387_v14 }
 0x2e6   :  { %v498_v15 = vpop.eup %497 }
 0x2e7   :  { %v389_v16 = vmul.f32 %v498_v15, %v387_v14 }
 0x2e9   :  { %v390_v17 = vsub.f32 2.0, %v389_v16 }
 0x2eb   :  { %v391_v18 = vmul.f32 %v498_v15, %v390_v17 }
 0x2ed   :  { %v392_v19 = vmul.f32 %v496_v7, %v391_v18 }
 0x2ef   :  { %393 = vst.msk [vmem:[%s624_s7] sm:$0xff] %vm370_vm3, %v392_v19 }

</bundles_post_ra>
